<compile_context>
chip_gen: v7x
topology: tpu7x:2x2x1
jax: 0.10.0
libtpu: 0.0.40
codegen_flags: <defaults>
</compile_context>

<pallas_src>
import functools
import math

import jax
import jax.numpy as jnp
from jax.experimental import pallas as pl
from jax.experimental.pallas import tpu as pltpu


# ----------------------------------------------------------------------------
# Fast path: L == 1.  softmax over a single key is identity, so the whole module
# is one fused matmul:  out = x @ W_fused + b_fused.
# ----------------------------------------------------------------------------
def scaled_attention_l1_kernel(x_ref, w_ref, b_ref, o_ref):
    y = jnp.dot(x_ref[...], w_ref[...], preferred_element_type=jnp.float32)
    o_ref[...] = (y + b_ref[...]).astype(o_ref.dtype)


# ----------------------------------------------------------------------------
# General path: L > 1.  Fused QKV, leading-batch-dim MXU matmuls, per-row rsqrt.
# (The PyTorch module itself only supports L == 1; this follows the natural math.)
# ----------------------------------------------------------------------------
def scaled_attention_kernel(x_ref, wqkv_ref, bqkv_ref, ls_ref, wo_ref, bo_ref,
                            o_ref, *, num_heads, head_dim):
    bn, L, C = x_ref.shape
    H, hd = num_heads, head_dim
    x2 = x_ref[...].reshape(bn * L, C)

    # Single fused QKV projection on the MXU (f32 accumulation).
    qkv = jnp.dot(x2, wqkv_ref[...], preferred_element_type=jnp.float32) + bqkv_ref[...]
    # Leading batch dims (bn, H, L, hd) so the batched matmuls need no relayout.
    q = qkv[:, :C].reshape(bn, L, H, hd).transpose(0, 2, 1, 3)
    k = qkv[:, C:2 * C].reshape(bn, L, H, hd).transpose(0, 2, 1, 3)
    v = qkv[:, 2 * C:].reshape(bn, L, H, hd).transpose(0, 2, 1, 3)

    # scores[b,h,i,j] = sum_d q[b,h,i,d] * k[b,h,j,d]   -> (bn, H, L, L)
    s = jax.lax.dot_general(q, k, (((3,), (3,)), ((0, 1), (0, 1))),
                            preferred_element_type=jnp.float32)

    # Per-row / per-column inverse norms: O(L) rsqrt on the EUP (not O(L^2)).
    # ls_ref holds exp(clamp(logit_scale, max)) / sqrt(scale), pre-folded.
    # No eps on the denominator (matches PyTorch): all-zero q/k row -> inf/NaN.
    rq = jax.lax.rsqrt(jnp.sum(q * q, axis=-1)) * ls_ref[...].reshape(1, H, 1)  # (bn,H,L)
    rk = jax.lax.rsqrt(jnp.sum(k * k, axis=-1))                                  # (bn,H,L)
    attn = s * rq[:, :, :, None] * rk[:, :, None, :]

    # Softmax over keys (attn_drop p=0.0 -> identity).  Exact reciprocal.
    m = jnp.max(attn, axis=-1, keepdims=True)
    e = jnp.exp(attn - m)
    p = e * pl.reciprocal(jnp.sum(e, axis=-1, keepdims=True), approx=False)

    # ctx[b,h,i,d] = sum_j p[b,h,i,j] * v[b,h,j,d]      -> (bn, H, L, hd)
    ctx = jax.lax.dot_general(p.astype(v.dtype), v, (((3,), (2,)), ((0, 1), (0, 1))),
                              preferred_element_type=jnp.float32)
    ctx = ctx.transpose(0, 2, 1, 3).reshape(bn * L, C)

    y = jnp.dot(ctx.astype(wo_ref.dtype), wo_ref[...],
                preferred_element_type=jnp.float32) + bo_ref[...]
    o_ref[...] = y.reshape(o_ref.shape).astype(o_ref.dtype)
    # TODO(synk): for large L, tile keys with an online (flash-style) softmax so the
    # (bn,H,L,L) intermediates never materialize; unnecessary for the shipped L == 1.


# ----------------------------------------------------------------------------
# Helpers: core-count detection and batch-block selection.
# ----------------------------------------------------------------------------
def _num_tensorcores():
    """Best-effort TensorCore count per device (v7x has 2; v5e/v6e have 1)."""
    try:
        kind = (getattr(jax.devices()[0], "device_kind", "") or "").lower()
        if "v7" in kind or "7x" in kind:
            return 2
    except Exception:
        pass
    return 1


def _pick_block_n(N, n_split, max_rows):
    """Largest batch block that divides N, satisfies the sublane constraint
    (multiple of 8 or full extent), targets N // n_split rows, capped at max_rows."""
    target = max(1, min(N // max(n_split, 1), max_rows))
    for b in range(target, 0, -1):
        if N % b == 0 and (b % 8 == 0 or b == N):
            return b
    return N


# ----------------------------------------------------------------------------
# Wrapper: layout + parameter folding (plain JAX) + pallas_call.
# ----------------------------------------------------------------------------
def scaled_attention(x_lnc, w_qkv, b_qkv, logit_scale, w_out, b_out, *,
                     num_heads, logit_scale_max=math.log(1.0 / 0.01),
                     block_n=None, compute_dtype=jnp.bfloat16,
                     vmem_limit_bytes=32 * 1024 * 1024):
    """x_lnc: (L, N, C).  compute_dtype controls MXU operand dtype — bf16 works on
    v5e/v6e/v7x MXUs (accumulation and all elementwise math stay f32); pass
    jnp.float32 for bit-tighter results."""
    L, N, C = x_lnc.shape
    assert C % num_heads == 0
    head_dim = C // num_heads
    scale = head_dim ** -0.5

    if block_n is None:
        # One grid step per TensorCore at small N (uses both v7x cores via the
        # "parallel" axis); cap for huge N so the pipeline has several steps.
        block_n = _pick_block_n(N, _num_tensorcores(), max_rows=8192)
    assert N % block_n == 0
    grid = (N // block_n,)
    const2d = lambda i: (0, 0)

    compiler_params = pltpu.CompilerParams(
        dimension_semantics=("parallel",),
        vmem_limit_bytes=vmem_limit_bytes)
    # TODO(synk): for large C, mark the constant weight BlockSpecs single-buffered
    # (pipeline_mode=pl.Buffered(1)) to halve their VMEM footprint; with a 1-2 step
    # grid here the weights are fetched once regardless, so it is moot.

    if L == 1:
        # --- fast path: attention is identity at L == 1 ---
        # Fold Wv and Wout once in f32, then cast operands to compute_dtype.
        x2d = x_lnc.reshape(N, C).astype(compute_dtype)
        w_v = w_qkv[2 * C:3 * C]                                   # (C, C)
        b_v = b_qkv[2 * C:3 * C]
        w_fused = (w_v.T @ w_out.T).astype(compute_dtype)          # (C, C)
        b_fused = (b_v @ w_out.T + b_out).reshape(1, C).astype(jnp.float32)

        out = pl.pallas_call(
            scaled_attention_l1_kernel,
            out_shape=jax.ShapeDtypeStruct((N, C), jnp.float32),
            grid=grid,
            in_specs=[
                pl.BlockSpec((block_n, C), lambda i: (i, 0)),      # x
                pl.BlockSpec((C, C), const2d),                     # W_fused = Wv^T Wout^T
                pl.BlockSpec((1, C), const2d),                     # b_fused
            ],
            out_specs=pl.BlockSpec((block_n, C), lambda i: (i, 0)),
            compiler_params=compiler_params,
        )(x2d, w_fused, b_fused)
        return out.reshape(L, N, C)

    # --- general path (L > 1): natural per-sequence attention ---
    # TODO(synk): the PyTorch module only runs for L == 1; this path is unexercised
    # by the shipped shapes and follows the natural reading of the math.
    x_nlc = jnp.transpose(x_lnc, (1, 0, 2)).astype(compute_dtype)   # (N, L, C)
    wqkv_t = w_qkv.T.astype(compute_dtype)                          # (C, 3C)
    bqkv = b_qkv.reshape(1, 3 * C).astype(jnp.float32)
    wo_t = w_out.T.astype(compute_dtype)                            # (C, C)
    bo = b_out.reshape(1, C).astype(jnp.float32)
    # Fold exp(clamp(logit_scale)) and 1/sqrt(scale) once, outside the kernel.
    ls_scaled = (jnp.exp(jnp.minimum(logit_scale.reshape(1, num_heads),
                                     logit_scale_max)) / jnp.sqrt(scale)
                 ).astype(jnp.float32)

    kernel = functools.partial(scaled_attention_kernel,
                               num_heads=num_heads, head_dim=head_dim)
    out_nlc = pl.pallas_call(
        kernel,
        out_shape=jax.ShapeDtypeStruct((N, L, C), jnp.float32),
        grid=grid,
        in_specs=[
            pl.BlockSpec((block_n, L, C), lambda i: (i, 0, 0)),     # x
            pl.BlockSpec((C, 3 * C), const2d),                      # W_qkv^T fused
            pl.BlockSpec((1, 3 * C), const2d),                      # b_qkv fused
            pl.BlockSpec((1, num_heads), const2d),                  # pre-scaled logit_scale
            pl.BlockSpec((C, C), const2d),                          # Wout^T
            pl.BlockSpec((1, C), const2d),                          # bout
        ],
        out_specs=pl.BlockSpec((block_n, L, C), lambda i: (i, 0, 0)),
        compiler_params=compiler_params,
    )(x_nlc, wqkv_t, bqkv, ls_scaled, wo_t, bo)
    return jnp.transpose(out_nlc, (1, 0, 2))                        # (L, N, C)


# ----------------------------------------------------------------------------
# Plain-JAX mirror of the PyTorch forward (L must be 1, as in the module).
# ----------------------------------------------------------------------------
def ref_scaled_attention(x, w_qkv, b_qkv, logit_scale, w_out, b_out, *,
                         num_heads, logit_scale_max=math.log(1.0 / 0.01)):
    L, N, C = x.shape
    hd = C // num_heads
    scale = hd ** -0.5
    qkv = x @ w_qkv.T + b_qkv
    q, k, v = jnp.split(qkv, 3, axis=-1)
    q = q.reshape(L, N * num_heads, hd).transpose(1, 0, 2)
    k = k.reshape(L, N * num_heads, hd).transpose(1, 0, 2)
    v = v.reshape(L, N * num_heads, hd).transpose(1, 0, 2)
    qn = jnp.linalg.norm(q, axis=-1, keepdims=True)
    kn = jnp.linalg.norm(k, axis=-1, keepdims=True)
    cos = (q @ jnp.swapaxes(k, -2, -1)) / (qn @ jnp.swapaxes(kn, -2, -1))
    attn = cos / scale ** 0.5
    ls = jnp.exp(jnp.minimum(logit_scale, logit_scale_max))          # (H,1,1)
    attn = attn.reshape(N, num_heads, L, L) * ls
    attn = jax.nn.softmax(attn.reshape(-1, L, L), axis=-1)
    out = (attn @ v).transpose(1, 0, 2).reshape(L, N, C)
    return out @ w_out.T + b_out


if __name__ == "__main__":
    dim, num_heads = 64, 8
    head_dim = dim // num_heads
    L, N = 1, 64                      # matches `x = torch.rand(1, 64, 64)` in the source
    scale = head_dim ** -0.5

    key = jax.random.PRNGKey(0)
    kx, kw, kow, kob = jax.random.split(key, 4)
    x = jax.random.uniform(kx, (L, N, dim), jnp.float32)
    # deterministic parameter init mirroring __init__ shapes
    w_qkv = jax.random.normal(kw, (3 * dim, dim), jnp.float32) * scale
    b_qkv = jnp.zeros((3 * dim,), jnp.float32)
    logit_scale = jnp.log(10.0 * jnp.ones((num_heads, 1, 1), jnp.float32))
    bound = 1.0 / math.sqrt(dim)
    w_out = jax.random.uniform(kow, (dim, dim), jnp.float32, minval=-bound, maxval=bound)
    b_out = jax.random.uniform(kob, (dim,), jnp.float32, minval=-bound, maxval=bound)

    ref = ref_scaled_attention(x, w_qkv, b_qkv, logit_scale, w_out, b_out,
                               num_heads=num_heads)

    # Default path: bf16 MXU operands, f32 accumulation -> loose tolerance.
    out_bf16 = scaled_attention(x, w_qkv, b_qkv, logit_scale, w_out, b_out,
                                num_heads=num_heads)
    out_bf16 = jax.block_until_ready(out_bf16)
    assert out_bf16.shape == (L, N, dim)
    err_bf16 = float(jnp.max(jnp.abs(out_bf16 - ref)))
    assert err_bf16 < 5e-2, f"bf16 path max abs err {err_bf16}"

    # f32 operands for a tight numerical check against the reference.
    out_f32 = scaled_attention(x, w_qkv, b_qkv, logit_scale, w_out, b_out,
                               num_heads=num_heads, compute_dtype=jnp.float32)
    out_f32 = jax.block_until_ready(out_f32)
    err_f32 = float(jnp.max(jnp.abs(out_f32 - ref)))
    assert jnp.allclose(out_f32, ref, atol=1e-4, rtol=1e-4), f"f32 path max abs err {err_f32}"

    print("KERNEL_OK")
</pallas_src>

<mosaic_0001>
module attributes {stable_mosaic.version = 11 : i64} {
  func.func @scaled_attention_l1_kernel(%arg0: i32, %arg1: memref<64x64xbf16, #tpu.memory_space<vmem>>, %arg2: memref<64x64xbf16, #tpu.memory_space<vmem>>, %arg3: memref<1x64xf32, #tpu.memory_space<vmem>>, %arg4: memref<64x64xf32, #tpu.memory_space<vmem>>) attributes {dimension_semantics = [#tpu.dimension_semantics<parallel>], iteration_bounds = array<i64: 1>, scalar_prefetch = 0 : i64, scratch_operands = 0 : i64, tpu.core_type = #tpu.core_type<tc>, window_params = [{transform_indices = @transform_0, window_bounds = array<i64: 64, 64>}, {pipeline_mode = #tpu.pipeline_mode<synchronous>, transform_indices = @transform_1, window_bounds = array<i64: 64, 64>}, {pipeline_mode = #tpu.pipeline_mode<synchronous>, transform_indices = @transform_2, window_bounds = array<i64: 1, 64>}, {transform_indices = @transform_3, window_bounds = array<i64: 64, 64>}]} {
    %c0 = arith.constant 0 : index
    %c0_0 = arith.constant 0 : index
    %0 = vector.load %arg1[%c0, %c0_0] : memref<64x64xbf16, #tpu.memory_space<vmem>>, vector<64x64xbf16>
    %c0_1 = arith.constant 0 : index
    %c0_2 = arith.constant 0 : index
    %1 = vector.load %arg2[%c0_1, %c0_2] : memref<64x64xbf16, #tpu.memory_space<vmem>>, vector<64x64xbf16>
    %cst = arith.constant dense<0.000000e+00> : vector<64x64xf32>
    %2 = tpu.matmul %0, %1, %cst {dimension_numbers = #tpu.dot_dimension_numbers<[1], [0], [0], [1], [0, 0, 1, 1], [], []>} : vector<64x64xbf16>, vector<64x64xbf16>, vector<64x64xf32> -> vector<64x64xf32>
    %c0_3 = arith.constant 0 : index
    %c0_4 = arith.constant 0 : index
    %3 = vector.load %arg3[%c0_3, %c0_4] : memref<1x64xf32, #tpu.memory_space<vmem>>, vector<1x64xf32>
    %4 = vector.broadcast %3 : vector<1x64xf32> to vector<64x64xf32>
    %5 = arith.addf %2, %4 : vector<64x64xf32>
    %c0_5 = arith.constant 0 : index
    %c0_6 = arith.constant 0 : index
    %6 = vector.load %arg4[%c0_5, %c0_6] : memref<64x64xf32, #tpu.memory_space<vmem>>, vector<64x64xf32>
    tpu.vector_store %arg4[%c0_5, %c0_6], %5 {strides = array<i32>} : memref<64x64xf32, #tpu.memory_space<vmem>>, vector<64x64xf32>,
    return
  }
  func.func @transform_0(%arg0: i32) -> (i32, i32) {
    %c0_i32 = arith.constant 0 : i32
    %c0_i32_0 = arith.constant 0 : i32
    return %arg0, %c0_i32 : i32, i32
  }
  func.func @transform_1(%arg0: i32) -> (i32, i32) {
    %c0_i32 = arith.constant 0 : i32
    %c0_i32_0 = arith.constant 0 : i32
    %c0_i32_1 = arith.constant 0 : i32
    return %c0_i32, %c0_i32_0 : i32, i32
  }
  func.func @transform_2(%arg0: i32) -> (i32, i32) {
    %c0_i32 = arith.constant 0 : i32
    %c0_i32_0 = arith.constant 0 : i32
    %c0_i32_1 = arith.constant 0 : i32
    return %c0_i32, %c0_i32_0 : i32, i32
  }
  func.func @transform_3(%arg0: i32) -> (i32, i32) {
    %c0_i32 = arith.constant 0 : i32
    %c0_i32_0 = arith.constant 0 : i32
    return %arg0, %c0_i32 : i32, i32
  }
}

</mosaic_0001>

<bundles_post_ra>
// kernel: tpu_custom_call.1
= control target key start
LH: loop header
LB: loop body
LE: loop exit
PB: predicated region body
PF: predicated region fallthrough
CT: control target
= control target key end

     0   :  { %8 = vsyncpa [#allocation3], 0  ;;  %s425_s0 = inlined_call_operand.hbm [shape: bf16[64,64], index: 0, kind: input, shape index: {}]   ;;  %s426_s1 = inlined_call_operand.hbm [shape: bf16[64,64], index: 1, kind: input, shape index: {}]   ;;  %s427_s2 = inlined_call_operand.vmem [shape: f32[1,64], index: 2, kind: input, shape index: {}]   ;;  %s428_s3 = inlined_call_operand.hbm [shape: f32[64,64], index: 3, kind: output, shape index: {}]  }
   0x1   :  { %9 = vsyncpa [#allocation6], 0 }
   0x2   :  { %10 = vsyncpa [#allocation4], 0  ;;  %s347_s12 = smov [#allocation2]   ;;  %s275_s16 = scalar_lea.hbm %s425_s0, 512 }
   0x3   :  { %s16_s13 = sshll.u32 %s347_s12, 4  ;;  %p276_p0 = scmp.ne.s32.totalorder %s425_s0, %s275_s16  ;;  %s17_s13 = int_to_ptr.vmem [resolvable:$true] %s16_s13 }
   0x4   :  { %p279_p1 = scmp.lt.u32.totalorder %s275_s16, %s425_s0 }
   0x6   :  { %p281_p2 = pnand %p279_p1, %p276_p0 }
   0x8   :  { %284 = shalt.err (!%p281_p2)
}
   0x9   :  { %s285_s21 = scalar_lea.vmem %s17_s13, 512  ;;  %p290_p4 = scmp.lt.s32.totalorder %s17_s13, %s17_s13 }
   0xa   :  { %p286_p3 = scmp.ne.s32.totalorder %s17_s13, %s285_s21  ;;  %p291_p5 = scmp.lt.s32.totalorder %s285_s21, %s285_s21 }
   0xc   :  { %p292_p6 = por %p291_p5, %p290_p4 }
   0xe   :  { %p293_p7 = pnand %p292_p6, %p286_p3 }
  0x10   :  { %296 = shalt.err (!%p293_p7)
}
  0x11   :  { %s348_s22 = smov 64   ;;  %s349_s23 = smov 4  }
  0x12   :  { %22 = dma.hbm_to_vmem [thread:$0]  %s425_s0, 512, %s17_s13, [#allocation3], %s348_s22, %s348_s22, %s349_s23  }
  0x13   :  { %s350_s26 = smov [#allocation5]   ;;  %s297_s30 = scalar_lea.hbm %s426_s1, 512 }
  0x14   :  { %s28_s27 = sshll.u32 %s350_s26, 4  ;;  %p298_p8 = scmp.ne.s32.totalorder %s426_s1, %s297_s30  ;;  %s29_s27 = int_to_ptr.vmem [resolvable:$true] %s28_s27 }
  0x15   :  { %p301_p9 = scmp.lt.u32.totalorder %s297_s30, %s426_s1 }
  0x17   :  { %p303_p10 = pnand %p301_p9, %p298_p8 }
  0x19   :  { %306 = shalt.err (!%p303_p10)
}
  0x1a   :  { %s307_s8 = scalar_lea.vmem %s29_s27, 512  ;;  %p312_p12 = scmp.lt.s32.totalorder %s29_s27, %s29_s27 }
  0x1b   :  { %p308_p11 = scmp.ne.s32.totalorder %s29_s27, %s307_s8  ;;  %p313_p13 = scmp.lt.s32.totalorder %s307_s8, %s307_s8 }
  0x1d   :  { %p314_p0 = por %p313_p13, %p312_p12 }
  0x1f   :  { %p315_p1 = pnand %p314_p0, %p308_p11 }
  0x21   :  { %318 = shalt.err (!%p315_p1)
}
  0x22   :  { %34 = dma.hbm_to_vmem [thread:$0]  %s426_s1, 512, %s29_s27, [#allocation6], %s348_s22, %s348_s22, %s349_s23  }
  0x23   :  { %341 = dma.done.wait [#allocation3], 512  }
  0x24   :  { %342 = vsyncadd [#allocation3], 4294966784 }
  0x25   :  { %343 = dma.done.wait [#allocation6], 512  }
  0x26   :  { %344 = vsyncadd [#allocation6], 4294966784  ;;  %v267_v0 = vld [vmem:[#allocation5] sm:$0xff]   ;;  %v268_v1 = vld [vmem:[#allocation5 + $0x8] sm:$0xff]   ;;  %vm111_vm0 = vcmask 523264   ;;  %s351_s11 = smov [#allocation7]  }
  0x27   :  { %236 = vmatprep.subr.bf16.mxu0 %v267_v0  ;;  %252 = vmatprep.subr.bf16.mxu1 %v267_v0  ;;  %v269_v2 = vld [vmem:[#allocation5 + $0x10] sm:$0xff]   ;;  %v271_v3 = vld [vmem:[#allocation2] sm:$0xff]   ;;  %v270_v5 = vld [vmem:[#allocation5 + $0x18] sm:$0xff]   ;;  %s202_s12 = sshll.u32 %s351_s11, 4  ;;  %s203_s12 = int_to_ptr.vmem [resolvable:$true] %s202_s12 }
  0x28   :  { %237 = vmatpush3.bf16.msra.mxu0 %v267_v0  ;;  %256 = vmatpush3.bf16.msra.mxu1 %v267_v0  ;;  %v272_v4 = vld [vmem:[#allocation2 + $0x10] sm:$0xff]   ;;  %v273_v6 = vld [vmem:[#allocation2 + $0x8] sm:$0xff]   ;;  %v274_v7 = vld [vmem:[#allocation2 + $0x18] sm:$0xff]   ;;  %p324_p3 = scmp.lt.s32.totalorder %s203_s12, %s203_s12 }
  0x29   :  { %238 = vmatprep.subr.bf16.mxu0 %v268_v1  ;;  %253 = vmatprep.subr.bf16.mxu1 %v268_v1  ;;  %v215_v8 = vld [vmem:[%s427_s2] ss:$0 sm:$0xff]  ;;  %s319_s2 = scalar_lea.vmem %s203_s12, 1024 }
  0x2a   :  { %244 = vmatprep.mubr.msk.bf16.mxu0 %vm111_vm0, %v271_v3  ;;  %248 = vmatprep.mubr.msk.bf16.mxu1 %vm111_vm0, %v272_v4  ;;  %p320_p2 = scmp.ne.s32.totalorder %s203_s12, %s319_s2  ;;  %p325_p4 = scmp.lt.s32.totalorder %s319_s2, %s319_s2 }
  0x2c   :  { %239 = vmatpush3.bf16.msra.mxu0 %v268_v1  ;;  %257 = vmatpush3.bf16.msra.mxu1 %v268_v1  ;;  %p326_p5 = por %p325_p4, %p324_p3 }
  0x2d   :  { %240 = vmatprep.subr.bf16.mxu0 %v269_v2  ;;  %254 = vmatprep.subr.bf16.mxu1 %v269_v2 }
  0x2e   :  { %p327_p6 = pnand %p326_p5, %p320_p2 }
  0x30   :  { %241 = vmatpush3.bf16.msra.mxu0 %v269_v2  ;;  %258 = vmatpush3.bf16.msra.mxu1 %v269_v2 }
  0x31   :  { %242 = vmatprep.subr.bf16.mxu0 %v270_v5  ;;  %255 = vmatprep.subr.bf16.mxu1 %v270_v5 }
  0x34   :  { %243 = vmatpush3.bf16.msra.mxu0 %v270_v5  ;;  %259 = vmatpush3.bf16.msra.mxu1 %v270_v5 }
  0x37   :  { %245 = vmatmul.mubr.msk.bf16.vlgmr.msra.gmra.mrb[0].mxu0 %vm111_vm0, %v273_v6  ;;  %249 = vmatmul.mubr.msk.bf16.vlgmr.msra.gmra.mrb[0].mxu1 %vm111_vm0, %v274_v7 }
 0x10a   :  { %v246_v9 = vpop.f32.mrb[0].mxu0  ;;  %v250_v10 = vpop.f32.mrb[0].mxu1 }
 0x10b   :  { %v167_v11 = vadd.f32 %v246_v9, %v215_v8  ;;  %v183_v12 = vadd.f32 %v250_v10, %v215_v8  ;;  %v158_v13 = vpop.f32.mrb[1].mxu0  ;;  %v174_v14 = vpop.f32.mrb[1].mxu1 }
 0x10c   :  { %v159_v15 = vadd.f32 %v215_v8, %v158_v13  ;;  %v175_v16 = vadd.f32 %v215_v8, %v174_v14  ;;  %v247_v17 = vpop.f32.mrb[2].mxu0  ;;  %v251_v18 = vpop.f32.mrb[2].mxu1 }
 0x10d   :  { %191 = vst.msk [vmem:[#allocation7 + $0x10] sm:$0xff] %vm111_vm0, %v167_v11  ;;  %195 = vst.msk [vmem:[#allocation7 + $0x30] sm:$0xff] %vm111_vm0, %v183_v12  ;;  %v170_v19 = vadd.f32 %v247_v17, %v215_v8  ;;  %v186_v20 = vadd.f32 %v251_v18, %v215_v8  ;;  %v161_v21 = vpop.f32.mrb[3].mxu0  ;;  %v177_v22 = vpop.f32.mrb[3].mxu1 }
 0x10e   :  { %189 = vst.msk [vmem:[#allocation7] sm:$0xff] %vm111_vm0, %v159_v15  ;;  %193 = vst.msk [vmem:[#allocation7 + $0x20] sm:$0xff] %vm111_vm0, %v175_v16  ;;  %v162_v23 = vadd.f32 %v215_v8, %v161_v21  ;;  %v178_v24 = vadd.f32 %v215_v8, %v177_v22 }
 0x10f   :  { %192 = vst.msk [vmem:[#allocation7 + $0x18] sm:$0xff] %vm111_vm0, %v170_v19  ;;  %196 = vst.msk [vmem:[#allocation7 + $0x38] sm:$0xff] %vm111_vm0, %v186_v20 }
 0x110   :  { %190 = vst.msk [vmem:[#allocation7 + $0x8] sm:$0xff] %vm111_vm0, %v162_v23  ;;  %194 = vst.msk [vmem:[#allocation7 + $0x28] sm:$0xff] %vm111_vm0, %v178_v24 }
 0x111   :  { %330 = shalt.err (!%p327_p6)
}
 0x112   :  { %s331_s15 = scalar_lea.hbm %s428_s3, 1024 }
 0x113   :  { %p332_p7 = scmp.ne.s32.totalorder %s428_s3, %s331_s15  ;;  %p335_p8 = scmp.lt.u32.totalorder %s331_s15, %s428_s3 }
 0x115   :  { %p337_p9 = pnand %p335_p8, %p332_p7 }
 0x117   :  { %340 = shalt.err (!%p337_p9)
}
 0x118   :  { %s352_s20 = smov 128   ;;  %s353_s21 = smov 8  }
 0x119   :  { %208 = dma.vmem_to_hbm [thread:$0]  %s203_s12, 1024, %s428_s3, [#allocation4], %s352_s20, %s352_s20, %s353_s21  }
 0x11a   :  { %345 = dma.done.wait [#allocation4], 1024  }
 0x11b   :  { %346 = vsyncadd [#allocation4], 4294966272 }
 0x11c   :  { %212 = vsyncpa [#allocation3], 1 }
 0x11d   :  { %213 = vsyncpa [#allocation6], 1 }
 0x11e   :  { %214 = vsyncpa [#allocation4], 1 }

</bundles_post_ra>
